<compile_context>
chip_gen: v7x
topology: tpu7x:2x2x1
jax: 0.10.0
libtpu: 0.0.40
codegen_flags: <defaults>
</compile_context>

<pallas_src>
import math
import functools

import jax
import jax.numpy as jnp
from jax import lax
from jax.experimental import pallas as pl
from jax.experimental.pallas import tpu as pltpu

EPS = 1e-5  # PyTorch nn.LayerNorm default


def _row_tile(n):
    """Largest 'nice' row tile that exactly divides n (multiple of 8), else the full n."""
    for t in (512, 256, 128, 64, 32, 16, 8):
        if n % t == 0:
            return t
    return n


def _dense_cp():
    return pltpu.CompilerParams(dimension_semantics=("parallel",))


# ----------------------------- Pallas kernels ------------------------------ #

def _layernorm_kernel(x_ref, g_ref, b_ref, o_ref):
    x = x_ref[...].astype(jnp.float32)
    mean = jnp.mean(x, axis=-1, keepdims=True)
    var = jnp.mean(jnp.square(x - mean), axis=-1, keepdims=True)
    y = (x - mean) * lax.rsqrt(var + EPS)
    o_ref[...] = (y * g_ref[...] + b_ref[...]).astype(o_ref.dtype)


def layer_norm_2d(x2d, gamma, beta):
    n, d = x2d.shape
    tm = _row_tile(n)
    return pl.pallas_call(
        _layernorm_kernel,
        grid=(n // tm,),
        in_specs=[
            pl.BlockSpec((tm, d), lambda i: (i, 0)),
            pl.BlockSpec((1, d), lambda i: (0, 0)),
            pl.BlockSpec((1, d), lambda i: (0, 0)),
        ],
        out_specs=pl.BlockSpec((tm, d), lambda i: (i, 0)),
        out_shape=jax.ShapeDtypeStruct((n, d), x2d.dtype),
        compiler_params=_dense_cp(),
    )(x2d, gamma[None, :], beta[None, :])


def _linear_nobias_kernel(x_ref, w_ref, o_ref):
    o_ref[...] = jnp.dot(
        x_ref[...].astype(jnp.bfloat16), w_ref[...],
        preferred_element_type=jnp.float32).astype(o_ref.dtype)


def linear_nobias(x2d, w):
    n, d_in = x2d.shape
    d_out = w.shape[1]
    tm = _row_tile(n)
    return pl.pallas_call(
        _linear_nobias_kernel,
        grid=(n // tm,),
        in_specs=[
            pl.BlockSpec((tm, d_in), lambda i: (i, 0)),
            pl.BlockSpec((d_in, d_out), lambda i: (0, 0)),
        ],
        out_specs=pl.BlockSpec((tm, d_out), lambda i: (i, 0)),
        out_shape=jax.ShapeDtypeStruct((n, d_out), x2d.dtype),
        compiler_params=_dense_cp(),
    )(x2d, w)


def _kv_proj_kernel(x_ref, wk_ref, wv_ref, bv_ref, k_ref, v_ref):
    # Fused K/V projection: one read of the activation tile, two MXU matmuls.
    x = x_ref[...].astype(jnp.bfloat16)
    k_ref[...] = jnp.dot(x, wk_ref[...],
                         preferred_element_type=jnp.float32).astype(k_ref.dtype)
    v_ref[...] = (jnp.dot(x, wv_ref[...], preferred_element_type=jnp.float32)
                  + bv_ref[...]).astype(v_ref.dtype)


def kv_projection(x2d, wk, wv, bv):
    n, d_in = x2d.shape
    d_out = wk.shape[1]
    tm = _row_tile(n)
    return pl.pallas_call(
        _kv_proj_kernel,
        grid=(n // tm,),
        in_specs=[
            pl.BlockSpec((tm, d_in), lambda i: (i, 0)),
            pl.BlockSpec((d_in, d_out), lambda i: (0, 0)),
            pl.BlockSpec((d_in, d_out), lambda i: (0, 0)),
            pl.BlockSpec((1, d_out), lambda i: (0, 0)),
        ],
        out_specs=(
            pl.BlockSpec((tm, d_out), lambda i: (i, 0)),
            pl.BlockSpec((tm, d_out), lambda i: (i, 0)),
        ),
        out_shape=(
            jax.ShapeDtypeStruct((n, d_out), x2d.dtype),
            jax.ShapeDtypeStruct((n, d_out), x2d.dtype),
        ),
        compiler_params=_dense_cp(),
    )(x2d, wk, wv, bv[None, :])


def _linear_res_kernel(x_ref, w_ref, b_ref, r_ref, o_ref):
    o_ref[...] = (
        r_ref[...]
        + jnp.dot(x_ref[...].astype(jnp.bfloat16), w_ref[...],
                  preferred_element_type=jnp.float32)
        + b_ref[...]
    ).astype(o_ref.dtype)


def linear_residual_2d(x2d, w, b, res2d):
    n, d_in = x2d.shape
    d_out = w.shape[1]
    tm = _row_tile(n)
    return pl.pallas_call(
        _linear_res_kernel,
        grid=(n // tm,),
        in_specs=[
            pl.BlockSpec((tm, d_in), lambda i: (i, 0)),
            pl.BlockSpec((d_in, d_out), lambda i: (0, 0)),
            pl.BlockSpec((1, d_out), lambda i: (0, 0)),
            pl.BlockSpec((tm, d_out), lambda i: (i, 0)),
        ],
        out_specs=pl.BlockSpec((tm, d_out), lambda i: (i, 0)),
        out_shape=jax.ShapeDtypeStruct((n, d_out), x2d.dtype),
        compiler_params=_dense_cp(),
    )(x2d, w, b[None, :], res2d)


def _ffn_kernel(x_ref, w1_ref, b1_ref, w2_ref, b2_ref, r_ref, o_ref):
    hidden = jnp.dot(x_ref[...].astype(jnp.bfloat16), w1_ref[...],
                     preferred_element_type=jnp.float32) + b1_ref[...]
    hidden = jnp.maximum(hidden, 0.0)  # ReLU (stats/activation math in f32)
    o = jnp.dot(hidden.astype(jnp.bfloat16), w2_ref[...],
                preferred_element_type=jnp.float32) + b2_ref[...]
    o_ref[...] = (r_ref[...] + o).astype(o_ref.dtype)


def feed_forward_2d(x2d, w1, b1, w2, b2, res2d):
    n, d_in = x2d.shape
    d_ff = w1.shape[1]
    d_out = w2.shape[1]
    tm = _row_tile(n)
    return pl.pallas_call(
        _ffn_kernel,
        grid=(n // tm,),
        in_specs=[
            pl.BlockSpec((tm, d_in), lambda i: (i, 0)),
            pl.BlockSpec((d_in, d_ff), lambda i: (0, 0)),
            pl.BlockSpec((1, d_ff), lambda i: (0, 0)),
            pl.BlockSpec((d_ff, d_out), lambda i: (0, 0)),
            pl.BlockSpec((1, d_out), lambda i: (0, 0)),
            pl.BlockSpec((tm, d_out), lambda i: (i, 0)),
        ],
        out_specs=pl.BlockSpec((tm, d_out), lambda i: (i, 0)),
        out_shape=jax.ShapeDtypeStruct((n, d_out), x2d.dtype),
        compiler_params=pltpu.CompilerParams(
            dimension_semantics=("parallel",),
            vmem_limit_bytes=32 * 1024 * 1024),
    )(x2d, w1, b1[None, :], w2, b2[None, :], res2d)


def _rel_attn_kernel(q_ref, k_ref, v_ref, u_ref, bd_ref, mask_ref, o_ref, *, scale):
    # One (batch, head) tile per grid step:
    #   q [Sq, Dk], k/v [Sk, Dk], u [1, Dk], bd [Sq, Sk] (precomputed relative term),
    #   mask [Sq, Sk] shared across the grid when batch-invariant.
    q = q_ref[0, 0]                                  # [Sq, Dk] f32
    k = k_ref[0, 0].astype(jnp.bfloat16)             # [Sk, Dk]
    v = v_ref[0, 0].astype(jnp.bfloat16)             # [Sk, Dk]
    qu = (q + u_ref[0]).astype(jnp.bfloat16)         # [Sq, Dk]

    # ac = (q + u) k^T   (MXU, bf16 in / f32 out)
    ac = lax.dot_general(qu, k, (((1,), (1,)), ((), ())),
                         preferred_element_type=jnp.float32)       # [Sq, Sk]

    scores = (ac + bd_ref[0, 0]) * scale                            # f32
    scores = jnp.where(mask_ref[0] != 0.0, scores, jnp.float32(-1e30))

    m = jnp.max(scores, axis=-1, keepdims=True)
    p = jnp.exp(scores - m)
    l = jnp.sum(p, axis=-1, keepdims=True)
    attn = p * pl.reciprocal(l, approx=True)                        # EUP reciprocal

    o_ref[0, 0] = lax.dot_general(attn.astype(jnp.bfloat16), v,
                                  (((1,), (0,)), ((), ())),
                                  preferred_element_type=jnp.float32).astype(o_ref.dtype)


# ------------------------------- JAX glue ---------------------------------- #

def rel_multihead_attention(ap, z, m_z, mask, residual2d):
    """RelativeMultiHeadAttention + output projection + residual add.

    z [Sq,B,D] (query, already layer-normed), m_z [Sk,B,D] (key/value, layer-normed),
    mask [Sq,Sk,Bm], residual2d [Sq*B, D].  Returns [Sq*B, D].
    """
    sq, b, d = z.shape
    sk = m_z.shape[0]
    h = ap["heads"]
    dk = d // h
    scale = 1.0 / math.sqrt(dk)

    # Projections: bias-free Q; fused K/V (single read of m_z).
    q2d = linear_nobias(z.reshape(sq * b, d), ap["wq"])
    k2d, v2d = kv_projection(m_z.reshape(sk * b, d), ap["wk"], ap["wv"], ap["bv"])

    q_bh = q2d.reshape(sq, b, h, dk).transpose(1, 2, 0, 3)   # [B, H, Sq, Dk]
    k_bh = k2d.reshape(sk, b, h, dk).transpose(1, 2, 0, 3)   # [B, H, Sk, Dk]
    v_bh = v2d.reshape(sk, b, h, dk).transpose(1, 2, 0, 3)   # [B, H, Sk, Dk]

    # ---- relative-position term  bd[b,h,i,j] = q.kpe[Sq+j-i] + kpb[Sq+j-i] ----
    # MXU matmul over the full (Sq+Sk) relative range, then the exact labml
    # shift_right + [:, -Sk:]  (zero-pad / reshape trick) applied at score level.
    P = ap["P"]
    L = sq + sk
    kpe = ap["key_pos_emb"][P - sk:P + sq]    # [L, H, Dk] (bf16)
    kpb = ap["key_pos_bias"][P - sk:P + sq]   # [L, H]     (f32)
    full = jnp.einsum('bhqd,lhd->bhql', q_bh.astype(jnp.bfloat16), kpe,
                      preferred_element_type=jnp.float32)            # [B, H, Sq, L]
    full = full + jnp.transpose(kpb, (1, 0))[None, :, None, :]
    pad = jnp.zeros(full.shape[:-1] + (1,), full.dtype)
    fp = jnp.concatenate([full, pad], axis=-1).reshape(b, h, L + 1, sq)
    bd = fp[:, :, :L, :].reshape(b, h, sq, L)[..., -sk:]              # [B, H, Sq, Sk]

    # mask: [Sq, Sk, Bm] -> [Bm, Sq, Sk]; shared block across the grid when Bm == 1.
    mask3 = jnp.transpose(mask.astype(jnp.float32), (2, 0, 1))
    if mask3.shape[0] == 1:
        mask_map = lambda bi, hi: (0, 0, 0)
    else:
        mask_map = lambda bi, hi: (bi, 0, 0)

    u3 = ap["query_pos_bias"][:, None, :]     # [H, 1, Dk], per-head (no B*H broadcast)

    o_bh = pl.pallas_call(
        functools.partial(_rel_attn_kernel, scale=scale),
        grid=(b, h),
        in_specs=[
            pl.BlockSpec((1, 1, sq, dk), lambda bi, hi: (bi, hi, 0, 0)),   # q
            pl.BlockSpec((1, 1, sk, dk), lambda bi, hi: (bi, hi, 0, 0)),   # k
            pl.BlockSpec((1, 1, sk, dk), lambda bi, hi: (bi, hi, 0, 0)),   # v
            pl.BlockSpec((1, 1, dk), lambda bi, hi: (hi, 0, 0)),           # u (per head)
            pl.BlockSpec((1, 1, sq, sk), lambda bi, hi: (bi, hi, 0, 0)),   # bd
            pl.BlockSpec((1, sq, sk), mask_map),                           # mask (dedup)
        ],
        out_specs=pl.BlockSpec((1, 1, sq, dk), lambda bi, hi: (bi, hi, 0, 0)),
        out_shape=jax.ShapeDtypeStruct((b, h, sq, dk), jnp.float32),
        compiler_params=pltpu.CompilerParams(
            dimension_semantics=("parallel", "parallel"),
            vmem_limit_bytes=32 * 1024 * 1024),
    )(q_bh, k_bh, v_bh, u3, bd, mask3)

    o2d = o_bh.transpose(2, 0, 1, 3).reshape(sq * b, d)   # [Sq*B, D]

    # self.output(x) fused with the layer residual (dropout = identity)
    return linear_residual_2d(o2d, ap["wo"], ap["bo"], residual2d)


def layer_forward(lp, x, mem, c_mem, mask):
    s, b, d = x.shape

    # Fused layernorm of [c_mem ; mem ; x]: LayerNorm is row-wise, so this equals
    # concat(norm(cat(c_mem, mem)), norm(x)) of the reference, in one kernel.
    if mem is not None:
        if c_mem is not None:
            stacked = jnp.concatenate([c_mem, mem, x], axis=0)
        else:
            stacked = jnp.concatenate([mem, x], axis=0)
    else:
        stacked = x
    sk = stacked.shape[0]
    m_z = layer_norm_2d(stacked.reshape(sk * b, d),
                        lp["ln_attn_g"], lp["ln_attn_b"]).reshape(sk, b, d)
    z = m_z[sk - s:]                       # normalized current tokens

    x2d = rel_multihead_attention(lp["attn"], z, m_z, mask,
                                  residual2d=x.reshape(s * b, d))
    x = x2d.reshape(s, b, d)

    z2 = layer_norm_2d(x.reshape(s * b, d), lp["ln_ff_g"], lp["ln_ff_b"])
    x = feed_forward_2d(z2, lp["w1"], lp["b1"], lp["w2"], lp["b2"],
                        res2d=x.reshape(s * b, d)).reshape(s, b, d)
    return x


def compressive_transformer_forward(params, x, mem, c_mem, mask):
    new_mem = []
    for i, lp in enumerate(params["layers"]):
        new_mem.append(x)                      # x.detach() equivalent
        m = mem[i] if mem else None
        cm = c_mem[i] if c_mem else None
        x = layer_forward(lp, x, m, cm, mask)
    s, b, d = x.shape
    out = layer_norm_2d(x.reshape(s * b, d), params["norm_g"], params["norm_b"]).reshape(s, b, d)
    return out, new_mem


# ------------------------------ parameters --------------------------------- #

def init_layer_params(key, d_model, heads, d_ff, P):
    d_k = d_model // heads
    ks = jax.random.split(key, 9)
    s = 0.02
    return dict(
        ln_attn_g=jnp.ones((d_model,), jnp.float32),
        ln_attn_b=jnp.zeros((d_model,), jnp.float32),
        ln_ff_g=jnp.ones((d_model,), jnp.float32),
        ln_ff_b=jnp.zeros((d_model,), jnp.float32),
        attn=dict(
            heads=heads, P=P,
            # matmul weights stored in bf16 (MXU-native); biases / LN / softmax in f32
            wq=(jax.random.normal(ks[0], (d_model, heads * d_k)) * s).astype(jnp.bfloat16),
            wk=(jax.random.normal(ks[1], (d_model, heads * d_k)) * s).astype(jnp.bfloat16),
            wv=(jax.random.normal(ks[2], (d_model, heads * d_k)) * s).astype(jnp.bfloat16),
            bv=jnp.zeros((heads * d_k,), jnp.float32),
            wo=(jax.random.normal(ks[3], (d_model, d_model)) * s).astype(jnp.bfloat16),
            bo=jnp.zeros((d_model,), jnp.float32),
            key_pos_emb=(jax.random.normal(ks[4], (2 * P, heads, d_k)) * s).astype(jnp.bfloat16),
            key_pos_bias=(jax.random.normal(ks[5], (2 * P, heads)) * s).astype(jnp.float32),
            query_pos_bias=(jax.random.normal(ks[6], (heads, d_k)) * s).astype(jnp.float32),
        ),
        w1=(jax.random.normal(ks[7], (d_model, d_ff)) * s).astype(jnp.bfloat16),
        b1=jnp.zeros((d_ff,), jnp.float32),
        w2=(jax.random.normal(ks[8], (d_ff, d_model)) * s).astype(jnp.bfloat16),
        b2=jnp.zeros((d_model,), jnp.float32),
    )


def init_params(key, n_layers, d_model, heads, d_ff, P=2 ** 12):
    keys = jax.random.split(key, n_layers)
    return dict(
        layers=[init_layer_params(keys[i], d_model, heads, d_ff, P) for i in range(n_layers)],
        norm_g=jnp.ones((d_model,), jnp.float32),
        norm_b=jnp.zeros((d_model,), jnp.float32),
    )


# --------------------------------- main ------------------------------------ #

if __name__ == "__main__":
    S, B, D, H, DFF = 8, 2, 32, 4, 64
    MEM_LEN, C_MEM_LEN, N_LAYERS = 8, 4, 2

    root = jax.random.PRNGKey(0)
    kp, kx, km, kc = jax.random.split(root, 4)

    params = init_params(kp, N_LAYERS, D, H, DFF)

    x = jax.random.normal(kx, (S, B, D), jnp.float32)
    mem = [jax.random.normal(jax.random.fold_in(km, i), (MEM_LEN, B, D), jnp.float32)
           for i in range(N_LAYERS)]
    c_mem = [jax.random.normal(jax.random.fold_in(kc, i), (C_MEM_LEN, B, D), jnp.float32)
             for i in range(N_LAYERS)]

    total = C_MEM_LEN + MEM_LEN + S
    # mask[i, j, 0] = True if query token i can attend to key token j
    i_idx = jnp.arange(S)[:, None]
    j_idx = jnp.arange(total)[None, :]
    mask = (j_idx <= i_idx + (C_MEM_LEN + MEM_LEN)).astype(jnp.float32)[:, :, None]  # [S, total, 1]

    out, new_mem = compressive_transformer_forward(params, x, mem, c_mem, mask)
    out = jax.block_until_ready(out)
    for nm in new_mem:
        jax.block_until_ready(nm)

    assert out.shape == (S, B, D)
    assert len(new_mem) == N_LAYERS
    print("KERNEL_OK")
</pallas_src>

<mosaic_0001>
module attributes {stable_mosaic.version = 11 : i64} {
  func.func @_layernorm_kernel(%arg0: i32, %arg1: memref<8x32xf32, #tpu.memory_space<vmem>>, %arg2: memref<1x32xf32, #tpu.memory_space<vmem>>, %arg3: memref<1x32xf32, #tpu.memory_space<vmem>>, %arg4: memref<8x32xf32, #tpu.memory_space<vmem>>) attributes {dimension_semantics = [#tpu.dimension_semantics<parallel>], iteration_bounds = array<i64: 5>, scalar_prefetch = 0 : i64, scratch_operands = 0 : i64, tpu.core_type = #tpu.core_type<tc>, window_params = [{transform_indices = @transform_0, window_bounds = array<i64: 8, 32>}, {pipeline_mode = #tpu.pipeline_mode<synchronous>, transform_indices = @transform_1, window_bounds = array<i64: 1, 32>}, {pipeline_mode = #tpu.pipeline_mode<synchronous>, transform_indices = @transform_2, window_bounds = array<i64: 1, 32>}, {transform_indices = @transform_3, window_bounds = array<i64: 8, 32>}]} {
    %c0 = arith.constant 0 : index
    %c0_0 = arith.constant 0 : index
    %0 = vector.load %arg1[%c0, %c0_0] : memref<8x32xf32, #tpu.memory_space<vmem>>, vector<8x32xf32>
    %cst = arith.constant dense<0.000000e+00> : vector<8xf32>
    %1 = vector.multi_reduction <add>, %0, %cst [1] : vector<8x32xf32> to vector<8xf32>
    %2 = vector.shape_cast %1 : vector<8xf32> to vector<8x1xf32>
    %cst_1 = arith.constant 3.200000e+01 : f32
    %3 = vector.broadcast %cst_1 : f32 to vector<8x1xf32>
    %4 = arith.divf %2, %3 : vector<8x1xf32>
    %5 = vector.broadcast %4 : vector<8x1xf32> to vector<8x32xf32>
    %6 = arith.subf %0, %5 : vector<8x32xf32>
    %7 = arith.mulf %6, %6 : vector<8x32xf32>
    %cst_2 = arith.constant dense<0.000000e+00> : vector<8xf32>
    %8 = vector.multi_reduction <add>, %7, %cst_2 [1] : vector<8x32xf32> to vector<8xf32>
    %9 = vector.shape_cast %8 : vector<8xf32> to vector<8x1xf32>
    %cst_3 = arith.constant 3.200000e+01 : f32
    %10 = vector.broadcast %cst_3 : f32 to vector<8x1xf32>
    %11 = arith.divf %9, %10 : vector<8x1xf32>
    %12 = vector.broadcast %4 : vector<8x1xf32> to vector<8x32xf32>
    %13 = arith.subf %0, %12 : vector<8x32xf32>
    %cst_4 = arith.constant 9.99999974E-6 : f32
    %14 = vector.broadcast %cst_4 : f32 to vector<8x1xf32>
    %15 = arith.addf %11, %14 : vector<8x1xf32>
    %16 = math.rsqrt %15 : vector<8x1xf32>
    %17 = vector.broadcast %16 : vector<8x1xf32> to vector<8x32xf32>
    %18 = arith.mulf %13, %17 : vector<8x32xf32>
    %c0_5 = arith.constant 0 : index
    %c0_6 = arith.constant 0 : index
    %19 = vector.load %arg2[%c0_5, %c0_6] : memref<1x32xf32, #tpu.memory_space<vmem>>, vector<1x32xf32>
    %20 = vector.broadcast %19 : vector<1x32xf32> to vector<8x32xf32>
    %21 = arith.mulf %18, %20 : vector<8x32xf32>
    %c0_7 = arith.constant 0 : index
    %c0_8 = arith.constant 0 : index
    %22 = vector.load %arg3[%c0_7, %c0_8] : memref<1x32xf32, #tpu.memory_space<vmem>>, vector<1x32xf32>
    %23 = vector.broadcast %22 : vector<1x32xf32> to vector<8x32xf32>
    %24 = arith.addf %21, %23 : vector<8x32xf32>
    %c0_9 = arith.constant 0 : index
    %c0_10 = arith.constant 0 : index
    %25 = vector.load %arg4[%c0_9, %c0_10] : memref<8x32xf32, #tpu.memory_space<vmem>>, vector<8x32xf32>
    tpu.vector_store %arg4[%c0_9, %c0_10], %24 {strides = array<i32>} : memref<8x32xf32, #tpu.memory_space<vmem>>, vector<8x32xf32>,
    return
  }
  func.func @transform_0(%arg0: i32) -> (i32, i32) {
    %c0_i32 = arith.constant 0 : i32
    %c0_i32_0 = arith.constant 0 : i32
    return %arg0, %c0_i32 : i32, i32
  }
  func.func @transform_1(%arg0: i32) -> (i32, i32) {
    %c0_i32 = arith.constant 0 : i32
    %c0_i32_0 = arith.constant 0 : i32
    %c0_i32_1 = arith.constant 0 : i32
    return %c0_i32, %c0_i32_0 : i32, i32
  }
  func.func @transform_2(%arg0: i32) -> (i32, i32) {
    %c0_i32 = arith.constant 0 : i32
    %c0_i32_0 = arith.constant 0 : i32
    %c0_i32_1 = arith.constant 0 : i32
    return %c0_i32, %c0_i32_0 : i32, i32
  }
  func.func @transform_3(%arg0: i32) -> (i32, i32) {
    %c0_i32 = arith.constant 0 : i32
    %c0_i32_0 = arith.constant 0 : i32
    return %arg0, %c0_i32 : i32, i32
  }
}

</mosaic_0001>

<bundles_post_ra>
// kernel: tpu_custom_call.1
= control target key start
LH: loop header
LB: loop body
LE: loop exit
PB: predicated region body
PF: predicated region fallthrough
CT: control target
= control target key end

     0   :  { %s301_s12 = smov 0   ;;  %s327_s0 = inlined_call_operand.vmem [shape: f32[40,32], index: 0, kind: input, shape index: {}]   ;;  %s328_s1 = inlined_call_operand.vmem [shape: f32[1,32], index: 1, kind: input, shape index: {}]   ;;  %s329_s2 = inlined_call_operand.vmem [shape: f32[1,32], index: 2, kind: input, shape index: {}]   ;;  %s330_s3 = inlined_call_operand.vmem [shape: f32[40,32], index: 3, kind: output, shape index: {}]  }
   0x1 LB: > { %s252_s13 = sadd.s32 4294967295, %s279_s12   ;;  %p256_p0 = scmp.ge.s32.totalorder %s279_s12, 1  ;;  %s279_s12 = sphi %s301_s12, %s13_s12  }
   0x2   : > { %p136_p1 = scmp.lt.s32.totalorder %s279_s12, 6 }
   0x4   : > { %p137_p2 = pnand %p256_p0, %p136_p1 }
   0x5   : > { %p158_p3 = scmp.lt.s32.totalorder (!%p137_p2), %s252_s13, 4  ;;  %vm167_vm0 = vcmask (!%p137_p2), 261120   ;;  %v259_v11 = vld [vmem:[%s328_s1] ss:$0 sm:$0xff] (!%p137_p2) }
   0x6   : > { %140 = sbr.rel (%p137_p2) target bundleno = 331 (0x14b), region = 32  ;;  %v260_v13 = vld [vmem:[%s329_s2] ss:$0 sm:$0xff] (!%p137_p2) }
   0xd   : > { %s332_s13 = smov (!%p158_p3, %s252_s13), 4 }
   0xe   : > { %s257_s14 = sshll.u32 %s332_s13, 3 }
   0xf   : > { %s161_s17 = scalar_lea.vmem %s327_s0, %s257_s14  ;;  %s165_s24 = scalar_lea.vmem %s330_s3, %s257_s14 }
  0x10   : > { %v166_v0 = vld [vmem:[%s161_s17] sm:$0xff] }
  0x11   : > { %v168_v1 = vsel %vm167_vm0, %v166_v0, 0.0 }
  0x12   : > { %169 = vadd.xlane.f32.xlu0 %v168_v1 }
  0x9f   : > { %v170_v2 = vpop.xlane.xlu0 %169 }
  0xa0   : > { %v172_v3 = vmul.f32 0.03125, %v170_v2 }
  0xa2   : > { %v173_v4 = vsub.f32 %v166_v0, %v172_v3 }
  0xa4   : > { %v174_v5 = vmul.f32 %v173_v4, %v173_v4 }
  0xa6   : > { %v175_v6 = vsel %vm167_vm0, %v174_v5, 0.0 }
  0xa7   : > { %176 = vadd.xlane.f32.xlu0 %v175_v6 }
 0x134   : > { %v177_v7 = vpop.xlane.xlu0 %176 }
 0x135   : > { %v178_v8 = vmul.f32 0.03125, %v177_v7 }
 0x137   : > { %v179_v9 = vadd.f32 1e-05, %v178_v8 }
 0x139   : > { %271 = vrsqrt.f32 %v179_v9 }
 0x143   : > { %v272_v10 = vpop.eup %271 }
 0x144   : > { %v181_v12 = vmul.f32 %v272_v10, %v173_v4 }
 0x146   : > { %v189_v14 = vmul.f32 %v259_v11, %v181_v12 }
 0x148   : > { %v197_v15 = vadd.f32 %v260_v13, %v189_v14 }
 0x14a   : > { %198 = vst.msk [vmem:[%s165_s24] sm:$0xff] %vm167_vm0, %v197_v15 }
 0x14b PF: > { %s13_s12 = sadd.s32 1, %s279_s12  }
 0x14c   : > { %p10_p4 = scmp.ge.s32.totalorder %s13_s12, 7  }
 0x14e   :  { %12 = sbr.rel (!%p10_p4) target bundleno = 1 (0x1), region = 62 }

</bundles_post_ra>
